<compile_context>
chip_gen: v5e
topology: v5e:2x2
jax: 0.10.0
libtpu: 0.0.40
codegen_flags: <defaults>
</compile_context>

<pallas_src>
import functools

import jax
import jax.numpy as jnp
from jax.experimental import pallas as pl
from jax.experimental.pallas import tpu as pltpu


def _round_up(n, m):
    return (n + m - 1) // m * m


def traffic_mlp_kernel(x_ref, w1_ref, b1_ref, w2_ref, b2_ref, o_ref):
    # fc1: cast the x tile to bf16 in-kernel, MXU matmul with f32 accumulation,
    # bias add + ReLU in f32 on the VPU.
    x_bf = x_ref[...].astype(jnp.bfloat16)
    h = jnp.dot(x_bf, w1_ref[...], preferred_element_type=jnp.float32)
    h = jnp.maximum(h + b1_ref[...], 0.0)
    # fc2: bf16 MXU inputs, f32 accumulation, f32 bias add.  The output block
    # is only O lanes wide (masked vst.msk), which is much cheaper here than a
    # lane-padded 128-wide writeback.
    y = jnp.dot(h.astype(jnp.bfloat16), w2_ref[...],
                preferred_element_type=jnp.float32)
    o_ref[...] = (y + b2_ref[...]).astype(o_ref.dtype)


def prepare_params(w1_t, b1, w2_t, b2):
    """One-time parameter prep, hoisted out of the per-call forward path.

    w1_t: (I, H)  -- nn.Linear fc1 weight, pre-transposed to (in, out)
    b1:   (H,) or (1, H)
    w2_t: (H, O)  -- nn.Linear fc2 weight, pre-transposed to (in, out)
    b2:   (O,) or (1, O)
    """
    return (w1_t.astype(jnp.bfloat16),
            jnp.reshape(b1, (1, -1)).astype(jnp.float32),
            w2_t.astype(jnp.bfloat16),
            jnp.reshape(b2, (1, -1)).astype(jnp.float32))


@functools.partial(jax.jit, static_argnames=("grid_steps",))
def traffic_mlp_forward(x, w1_bf, b1_f, w2_bf, b2_f, *, grid_steps=2):
    """x: (B, I) f32; prepared params from prepare_params()."""
    B, I = x.shape
    H = w1_bf.shape[1]
    O = w2_bf.shape[1]

    # Size the batch tile so the grid has exactly `grid_steps` steps:
    # grid=2 -> one step per TensorCore on v7x (megacore), and near-minimal
    # fixed per-grid-step overhead on single-TC v5e/v6e.  TB must be a
    # multiple of 8 sublanes.
    steps = max(1, grid_steps)
    TB = _round_up(pl.cdiv(B, steps), 8)
    B_pad = TB * steps
    if B_pad != B:
        x = jnp.zeros((B_pad, I), x.dtype).at[:B].set(x)

    flops = 2 * B_pad * (I * H + H * O)
    bytes_accessed = (B_pad * I * 4 + w1_bf.size * 2 + w2_bf.size * 2
                      + b1_f.size * 4 + b2_f.size * 4 + B_pad * O * 4)

    out = pl.pallas_call(
        traffic_mlp_kernel,
        out_shape=jax.ShapeDtypeStruct((B_pad, O), jnp.float32),
        grid_spec=pl.GridSpec(
            grid=(steps,),
            in_specs=[
                # Streamed: one batch tile of x (f32) per grid step.
                pl.BlockSpec((TB, I), lambda i: (i, 0)),
                # Resident: weights / biases, same block every step.
                pl.BlockSpec((I, H), lambda i: (0, 0)),
                pl.BlockSpec((1, H), lambda i: (0, 0)),
                pl.BlockSpec((H, O), lambda i: (0, 0)),
                pl.BlockSpec((1, O), lambda i: (0, 0)),
            ],
            out_specs=pl.BlockSpec((TB, O), lambda i: (i, 0)),
        ),
        compiler_params=pltpu.CompilerParams(
            dimension_semantics=("parallel",)),
        cost_estimate=pl.CostEstimate(
            flops=flops, transcendentals=0, bytes_accessed=bytes_accessed),
    )(x, w1_bf, b1_f, w2_bf, b2_f)

    return out[:B] if B_pad != B else out


if __name__ == "__main__":
    # Shapes consistent with TrafficMLP(input_size, hidden_size, output_size);
    # batch=1024 so the grid-of-2 batch tiling is actually exercised.
    batch, input_size, hidden_size, output_size = 1024, 16, 32, 4

    key = jax.random.PRNGKey(0)
    kx, kw1, kb1, kw2, kb2 = jax.random.split(key, 5)

    x = jax.random.normal(kx, (batch, input_size), dtype=jnp.float32)
    # nn.Linear weights are (out, in); stored pre-transposed as (in, out).
    w1_t = jax.random.normal(kw1, (input_size, hidden_size), jnp.float32) * 0.1
    b1 = jax.random.normal(kb1, (hidden_size,), jnp.float32) * 0.1
    w2_t = jax.random.normal(kw2, (hidden_size, output_size), jnp.float32) * 0.1
    b2 = jax.random.normal(kb2, (output_size,), jnp.float32) * 0.1

    # One-time param prep (would live at model-init time in real use).
    w1_bf, b1_f, w2_bf, b2_f = prepare_params(w1_t, b1, w2_t, b2)

    out = traffic_mlp_forward(x, w1_bf, b1_f, w2_bf, b2_f)
    out = jax.block_until_ready(out)

    # Pure-JAX reference mirroring the kernel numerics (bf16 MXU inputs,
    # f32 accumulation and epilogue).
    xb = x.astype(jnp.bfloat16).astype(jnp.float32)
    w1b = w1_t.astype(jnp.bfloat16).astype(jnp.float32)
    w2b = w2_t.astype(jnp.bfloat16).astype(jnp.float32)
    h_ref = jnp.maximum(xb @ w1b + b1[None, :], 0.0)
    ref = h_ref.astype(jnp.bfloat16).astype(jnp.float32) @ w2b + b2[None, :]

    assert out.shape == (batch, output_size)
    assert jnp.allclose(out, ref, atol=2e-3, rtol=2e-3), float(
        jnp.max(jnp.abs(out - ref)))

    print("KERNEL_OK")
</pallas_src>

<mosaic_0001>
module attributes {stable_mosaic.version = 11 : i64} {
  func.func @traffic_mlp_kernel(%arg0: i32, %arg1: memref<512x16xf32, #tpu.memory_space<vmem>>, %arg2: memref<16x32xbf16, #tpu.memory_space<vmem>>, %arg3: memref<1x32xf32, #tpu.memory_space<vmem>>, %arg4: memref<32x4xbf16, #tpu.memory_space<vmem>>, %arg5: memref<1x4xf32, #tpu.memory_space<vmem>>, %arg6: memref<512x4xf32, #tpu.memory_space<vmem>>) attributes {dimension_semantics = [#tpu.dimension_semantics<parallel>], iteration_bounds = array<i64: 2>, scalar_prefetch = 0 : i64, scratch_operands = 0 : i64, tpu.core_type = #tpu.core_type<tc>, window_params = [{transform_indices = @transform_0, window_bounds = array<i64: 512, 16>}, {pipeline_mode = #tpu.pipeline_mode<synchronous>, transform_indices = @transform_1, window_bounds = array<i64: 16, 32>}, {pipeline_mode = #tpu.pipeline_mode<synchronous>, transform_indices = @transform_2, window_bounds = array<i64: 1, 32>}, {pipeline_mode = #tpu.pipeline_mode<synchronous>, transform_indices = @transform_3, window_bounds = array<i64: 32, 4>}, {pipeline_mode = #tpu.pipeline_mode<synchronous>, transform_indices = @transform_4, window_bounds = array<i64: 1, 4>}, {transform_indices = @transform_5, window_bounds = array<i64: 512, 4>}]} {
    %c0 = arith.constant 0 : index
    %c0_0 = arith.constant 0 : index
    %0 = vector.load %arg1[%c0, %c0_0] : memref<512x16xf32, #tpu.memory_space<vmem>>, vector<512x16xf32>
    %1 = arith.truncf %0 : vector<512x16xf32> to vector<512x16xbf16>
    %c0_1 = arith.constant 0 : index
    %c0_2 = arith.constant 0 : index
    %2 = vector.load %arg2[%c0_1, %c0_2] : memref<16x32xbf16, #tpu.memory_space<vmem>>, vector<16x32xbf16>
    %cst = arith.constant dense<0.000000e+00> : vector<512x32xf32>
    %3 = tpu.matmul %1, %2, %cst {dimension_numbers = #tpu.dot_dimension_numbers<[1], [0], [0], [1], [0, 0, 1, 1], [], []>} : vector<512x16xbf16>, vector<16x32xbf16>, vector<512x32xf32> -> vector<512x32xf32>
    %c0_3 = arith.constant 0 : index
    %c0_4 = arith.constant 0 : index
    %4 = vector.load %arg3[%c0_3, %c0_4] : memref<1x32xf32, #tpu.memory_space<vmem>>, vector<1x32xf32>
    %5 = vector.broadcast %4 : vector<1x32xf32> to vector<512x32xf32>
    %6 = arith.addf %3, %5 : vector<512x32xf32>
    %cst_5 = arith.constant 0.000000e+00 : f32
    %7 = vector.broadcast %cst_5 : f32 to vector<512x32xf32>
    %8 = arith.maximumf %6, %7 : vector<512x32xf32>
    %9 = arith.truncf %8 : vector<512x32xf32> to vector<512x32xbf16>
    %c0_6 = arith.constant 0 : index
    %c0_7 = arith.constant 0 : index
    %10 = vector.load %arg4[%c0_6, %c0_7] : memref<32x4xbf16, #tpu.memory_space<vmem>>, vector<32x4xbf16>
    %cst_8 = arith.constant dense<0.000000e+00> : vector<512x4xf32>
    %11 = tpu.matmul %9, %10, %cst_8 {dimension_numbers = #tpu.dot_dimension_numbers<[1], [0], [0], [1], [0, 0, 1, 1], [], []>} : vector<512x32xbf16>, vector<32x4xbf16>, vector<512x4xf32> -> vector<512x4xf32>
    %c0_9 = arith.constant 0 : index
    %c0_10 = arith.constant 0 : index
    %12 = vector.load %arg5[%c0_9, %c0_10] : memref<1x4xf32, #tpu.memory_space<vmem>>, vector<1x4xf32>
    %13 = vector.broadcast %12 : vector<1x4xf32> to vector<512x4xf32>
    %14 = arith.addf %11, %13 : vector<512x4xf32>
    %c0_11 = arith.constant 0 : index
    %c0_12 = arith.constant 0 : index
    %15 = vector.load %arg6[%c0_11, %c0_12] : memref<512x4xf32, #tpu.memory_space<vmem>>, vector<512x4xf32>
    tpu.vector_store %arg6[%c0_11, %c0_12], %14 {strides = array<i32>} : memref<512x4xf32, #tpu.memory_space<vmem>>, vector<512x4xf32>,
    return
  }
  func.func @transform_0(%arg0: i32) -> (i32, i32) {
    %c0_i32 = arith.constant 0 : i32
    %c0_i32_0 = arith.constant 0 : i32
    return %arg0, %c0_i32 : i32, i32
  }
  func.func @transform_1(%arg0: i32) -> (i32, i32) {
    %c0_i32 = arith.constant 0 : i32
    %c0_i32_0 = arith.constant 0 : i32
    %c0_i32_1 = arith.constant 0 : i32
    return %c0_i32, %c0_i32_0 : i32, i32
  }
  func.func @transform_2(%arg0: i32) -> (i32, i32) {
    %c0_i32 = arith.constant 0 : i32
    %c0_i32_0 = arith.constant 0 : i32
    %c0_i32_1 = arith.constant 0 : i32
    return %c0_i32, %c0_i32_0 : i32, i32
  }
  func.func @transform_3(%arg0: i32) -> (i32, i32) {
    %c0_i32 = arith.constant 0 : i32
    %c0_i32_0 = arith.constant 0 : i32
    %c0_i32_1 = arith.constant 0 : i32
    return %c0_i32, %c0_i32_0 : i32, i32
  }
  func.func @transform_4(%arg0: i32) -> (i32, i32) {
    %c0_i32 = arith.constant 0 : i32
    %c0_i32_0 = arith.constant 0 : i32
    %c0_i32_1 = arith.constant 0 : i32
    return %c0_i32, %c0_i32_0 : i32, i32
  }
  func.func @transform_5(%arg0: i32) -> (i32, i32) {
    %c0_i32 = arith.constant 0 : i32
    %c0_i32_0 = arith.constant 0 : i32
    return %arg0, %c0_i32 : i32, i32
  }
}

</mosaic_0001>

<bundles_post_ra>
// kernel: traffic_mlp_forward.1
= control target key start
LH: loop header
LB: loop body
LE: loop exit
PB: predicated region body
PF: predicated region fallthrough
CT: control target
= control target key end

     0   :  { %s1247_s18 = smov 0   ;;  %s1678_s0 = inlined_call_operand.vmem [shape: f32[1024,16], index: 0, kind: input, shape index: {}]   ;;  %s1679_s1 = inlined_call_operand.vmem [shape: bf16[16,32], index: 1, kind: input, shape index: {}]   ;;  %s1680_s2 = inlined_call_operand.vmem [shape: f32[1,32], index: 2, kind: input, shape index: {}]   ;;  %s1681_s3 = inlined_call_operand.vmem [shape: bf16[32,4], index: 3, kind: input, shape index: {}]   ;;  %s1682_s4 = inlined_call_operand.vmem [shape: f32[1,4], index: 4, kind: input, shape index: {}]   ;;  %s1683_s5 = inlined_call_operand.vmem [shape: f32[1024,4], index: 5, kind: output, shape index: {}]  }
   0x1 LB: > { %s1106_s19 = sadd.s32 4294967295, %s1215_s18   ;;  %p1110_p0 = scmp.ge.s32.totalorder %s1215_s18, 1  ;;  %s1215_s18 = sphi %s1247_s18, %s15_s18  }
   0x2   : > { %p188_p1 = scmp.lt.s32.totalorder %s1215_s18, 3 }
   0x4   : > { %p189_p2 = pnand %p1110_p0, %p188_p1 }
   0x5   : > { %s1111_s22 = sshll.u32 (!%p189_p2), %s1106_s19, 6 }
   0x6   : > { %192 = sbr.rel (%p189_p2) target bundleno = 796 (0x31c), region = 40  ;;  %p217_p3 = scmp.lt.s32.totalorder (!%p189_p2), %s1111_s22, 127 }
   0xb   : > { %v1193_v0 = vld [vmem:[%s1679_s1] sm:$0xff]  ;;  %s1685_s22 = smov (!%p217_p3, %s1111_s22), 127  ;;  %vm337_vm0 = vcmask 130048   ;;  %v1195_v22 = vld [vmem:[%s1681_s3 + $0x8] sm:$0xff]  ;;  %vm719_vm1 = vcmask 261120   ;;  %vm985_vm2 = vcmask 31744  }
   0xc   : > { %441 = vmatpush.bf16.msra.mxu0 %v1193_v0  ;;  %1196 = vmatpush.bf16.msra.mxu3 %v1193_v0  ;;  %s1112_s23 = sshll.u32 %s1685_s22, 3  ;;  %v1194_v23 = vld [vmem:[%s1681_s3] sm:$0xff] }
   0xd   : > { %s1266_s26 = scalar_lea.vmem %s1678_s0, %s1112_s23  ;;  %822 = vmatpush.bf16.msra.mxu1 %v1195_v22  ;;  %1197 = vmatpush.bf16.msra.mxu2 %v1195_v22  ;;  %v1303_v31 = vld [vmem:[%s1680_s2] ss:$0 sm:$0xff]  ;;  %s1375_s12 = scalar_lea.vmem %s1683_s5, %s1112_s23 }
   0xe   : > { %v229_v1 = vld [vmem:[%s1266_s26] sm:$0xff]  ;;  %v230_v2 = vld [vmem:[%s1266_s26 + $0x8] sm:$0xff]  ;;  %v231_v4 = vld [vmem:[%s1266_s26 + $0x10] sm:$0xff] }
   0xf   : > { %v293_v3 = vpack.c.bf16 %v230_v2, %v229_v1  ;;  %v232_v5 = vld [vmem:[%s1266_s26 + $0x18] sm:$0xff]  ;;  %v233_v7 = vld [vmem:[%s1266_s26 + $0x20] sm:$0xff]  ;;  %v234_v8 = vld [vmem:[%s1266_s26 + $0x28] sm:$0xff] }
  0x10   : > { %v294_v6 = vpack.c.bf16 %v232_v5, %v231_v4  ;;  %v295_v9 = vpack.c.bf16 %v234_v8, %v233_v7  ;;  %v235_v10 = vld [vmem:[%s1266_s26 + $0x30] sm:$0xff]  ;;  %v236_v11 = vld [vmem:[%s1266_s26 + $0x38] sm:$0xff]  ;;  %v237_v13 = vld [vmem:[%s1266_s26 + $0x40] sm:$0xff] }
  0x11   : > { %1119 = vmatmul.msk.bf16.vlgmr.msra.gmra.mxu0 %vm337_vm0, %v293_v3  ;;  %v296_v12 = vpack.c.bf16 %v236_v11, %v235_v10  ;;  %v238_v14 = vld [vmem:[%s1266_s26 + $0x48] sm:$0xff]  ;;  %v239_v16 = vld [vmem:[%s1266_s26 + $0x50] sm:$0xff]  ;;  %v240_v17 = vld [vmem:[%s1266_s26 + $0x58] sm:$0xff]  ;;  %823 = vmatpush.bf16.msra.mxu1 %v1194_v23 }
  0x12   : > { %v297_v15 = vpack.c.bf16 %v238_v14, %v237_v13  ;;  %v298_v18 = vpack.c.bf16 %v240_v17, %v239_v16  ;;  %v241_v19 = vld [vmem:[%s1266_s26 + $0x60] sm:$0xff]  ;;  %v242_v20 = vld [vmem:[%s1266_s26 + $0x68] sm:$0xff]  ;;  %v243_v24 = vld [vmem:[%s1266_s26 + $0x70] sm:$0xff]  ;;  %1198 = vmatpush.bf16.msra.mxu2 %v1194_v23 }
  0x13   : > { %v299_v21 = vpack.c.bf16 %v242_v20, %v241_v19  ;;  %v244_v25 = vld [vmem:[%s1266_s26 + $0x78] sm:$0xff]  ;;  %v245_v27 = vld [vmem:[%s1266_s26 + $0x80] sm:$0xff]  ;;  %v246_v28 = vld [vmem:[%s1266_s26 + $0x88] sm:$0xff] }
  0x14   : > { %v300_v26 = vpack.c.bf16 %v244_v25, %v243_v24  ;;  %v301_v29 = vpack.c.bf16 %v246_v28, %v245_v27  ;;  %v247_v37 = vld [vmem:[%s1266_s26 + $0x90] sm:$0xff]  ;;  %v248_v38 = vld [vmem:[%s1266_s26 + $0x98] sm:$0xff]  ;;  %v249_v47 = vld [vmem:[%s1266_s26 + $0xa0] sm:$0xff] }
  0x15   : > { %v302_v40 = vpack.c.bf16 %v248_v38, %v247_v37  ;;  %v250_v48 = vld [vmem:[%s1266_s26 + $0xa8] sm:$0xff]  ;;  %v251_v57 = vld [vmem:[%s1266_s26 + $0xb0] sm:$0xff]  ;;  %v252_v58 = vld [vmem:[%s1266_s26 + $0xb8] sm:$0xff] }
  0x16   : > { %v303_v50 = vpack.c.bf16 %v250_v48, %v249_v47  ;;  %v304_v60 = vpack.c.bf16 %v252_v58, %v251_v57  ;;  %v253_v3 = vld [vmem:[%s1266_s26 + $0xc0] sm:$0xff]  ;;  %v254_v4 = vld [vmem:[%s1266_s26 + $0xc8] sm:$0xff]  ;;  %v255_v13 = vld [vmem:[%s1266_s26 + $0xd0] sm:$0xff] }
  0x17   : > { %v256_v14 = vld [vmem:[%s1266_s26 + $0xd8] sm:$0xff]  ;;  %v257_v23 = vld [vmem:[%s1266_s26 + $0xe0] sm:$0xff]  ;;  %v258_v24 = vld [vmem:[%s1266_s26 + $0xe8] sm:$0xff] }
  0x18   : > { %v306_v16 = vpack.c.bf16 %v256_v14, %v255_v13  ;;  %v263_v28 = vld [vmem:[%s1266_s26 + $0x110] sm:$0xff]  ;;  %v260_v38 = vld [vmem:[%s1266_s26 + $0xf8] sm:$0xff] }
  0x19   : > { %v259_v37 = vld [vmem:[%s1266_s26 + $0xf0] sm:$0xff] }
  0x21   : > { %1120 = vmatmul.msk.bf16.gmra.mxu0 %vm337_vm0, %v294_v6  ;;  %v305_v6 = vpack.c.bf16 %v254_v4, %v253_v3  ;;  %v269_v4 = vld [vmem:[%s1266_s26 + $0x140] sm:$0xff] }
  0x31   : > { %1121 = vmatmul.msk.bf16.gmra.mxu0 %vm337_vm0, %v295_v9 }
  0x41   : > { %1122 = vmatmul.msk.bf16.gmra.mxu0 %vm337_vm0, %v296_v12 }
  0x51   : > { %1123 = vmatmul.msk.bf16.gmra.mxu0 %vm337_vm0, %v297_v15 }
  0x61   : > { %1124 = vmatmul.msk.bf16.gmra.mxu0 %vm337_vm0, %v298_v18 }
  0x71   : > { %1125 = vmatmul.msk.bf16.gmra.mxu0 %vm337_vm0, %v299_v21 }
  0x81   : > { %1126 = vmatmul.msk.bf16.gmra.mxu0 %vm337_vm0, %v300_v26  ;;  %v307_v26 = vpack.c.bf16 %v258_v24, %v257_v23 }
  0x8e   : > { %v443_v30 = vpop.f32.mrf.mxu0 }
  0x8f   : > { %v444_v32 = vadd.f32 %v1303_v31, %v443_v30 }
  0x91   : > { %1127 = vmatmul.msk.bf16.gmra.mxu0 %vm337_vm0, %v301_v29  ;;  %v603_v35 = vmax.f32 %v444_v32, 0.0  ;;  %v264_v29 = vld [vmem:[%s1266_s26 + $0x118] sm:$0xff] }
  0x92   : > { %v310_v30 = vpack.c.bf16 %v264_v29, %v263_v28 }
  0x94   : > { %1136 = vmatmul.msk.bf16.vlgmr.msra.gmra.mxu3 %vm337_vm0, %v310_v30 }
  0x96   : > { %v445_v33 = vpop.f32.mrf.mxu0 }
  0x97   : > { %v446_v34 = vadd.f32 %v1303_v31, %v445_v33 }
  0x99   : > { %v604_v36 = vmax.f32 %v446_v34, 0.0 }
  0x9b   : > { %v667_v39 = vpack.c.bf16 %v604_v36, %v603_v35 }
  0x9d   : > { %1159 = vmatmul.msk.bf16.vlgmr.msra.gmra.mxu1 %vm719_vm1, %v667_v39 }
  0x9e   : > { %v448_v41 = vpop.f32.mrf.mxu0 }
  0x9f   : > { %v449_v42 = vadd.f32 %v1303_v31, %v448_v41 }
  0xa1   : > { %1128 = vmatmul.msk.bf16.gmra.mxu0 %vm337_vm0, %v302_v40  ;;  %v605_v45 = vmax.f32 %v449_v42, 0.0  ;;  %v308_v40 = vpack.c.bf16 %v260_v38, %v259_v37  ;;  %v265_v42 = vld [vmem:[%s1266_s26 + $0x120] sm:$0xff] }
  0xa6   : > { %v450_v43 = vpop.f32.mrf.mxu0 }
  0xa7   : > { %v451_v44 = vadd.f32 %v1303_v31, %v450_v43  ;;  %v266_v43 = vld [vmem:[%s1266_s26 + $0x128] sm:$0xff] }
  0xa9   : > { %v606_v46 = vmax.f32 %v451_v44, 0.0  ;;  %v311_v44 = vpack.c.bf16 %v266_v43, %v265_v42 }
  0xab   : > { %v668_v49 = vpack.c.bf16 %v606_v46, %v605_v45  ;;  %1137 = vmatmul.msk.bf16.gmra.mxu3 %vm337_vm0, %v311_v44 }
  0xad   : > { %1160 = vmatmul.msk.bf16.gmra.mxu1 %vm719_vm1, %v668_v49 }
  0xae   : > { %v453_v51 = vpop.f32.mrf.mxu0 }
  0xaf   : > { %v454_v52 = vadd.f32 %v1303_v31, %v453_v51  ;;  %v262_v51 = vld [vmem:[%s1266_s26 + $0x108] sm:$0xff] }
  0xb1   : > { %1129 = vmatmul.msk.bf16.gmra.mxu0 %vm337_vm0, %v303_v50  ;;  %v607_v55 = vmax.f32 %v454_v52, 0.0  ;;  %v261_v50 = vld [vmem:[%s1266_s26 + $0x100] sm:$0xff] }
  0xb6   : > { %v455_v53 = vpop.f32.mrf.mxu0 }
  0xb7   : > { %v456_v54 = vadd.f32 %v1303_v31, %v455_v53  ;;  %v309_v53 = vpack.c.bf16 %v262_v51, %v261_v50 }
  0xb9   : > { %v608_v56 = vmax.f32 %v456_v54, 0.0 }
  0xbb   : > { %v669_v59 = vpack.c.bf16 %v608_v56, %v607_v55  ;;  %v267_v55 = vld [vmem:[%s1266_s26 + $0x130] sm:$0xff]  ;;  %v268_v56 = vld [vmem:[%s1266_s26 + $0x138] sm:$0xff] }
  0xbc   : > { %v312_v57 = vpack.c.bf16 %v268_v56, %v267_v55 }
  0xbd   : > { %1161 = vmatmul.msk.bf16.gmra.mxu1 %vm719_vm1, %v669_v59 }
  0xbe   : > { %v458_v61 = vpop.f32.mrf.mxu0  ;;  %1138 = vmatmul.msk.bf16.gmra.mxu3 %vm337_vm0, %v312_v57 }
  0xbf   : > { %v459_v62 = vadd.f32 %v1303_v31, %v458_v61  ;;  %v1368_v61 = vld [vmem:[%s1682_s4] ss:$0 sm:$0xff] }
  0xc1   : > { %1130 = vmatmul.msk.bf16.gmra.mxu0 %vm337_vm0, %v304_v60  ;;  %v609_v1 = vmax.f32 %v459_v62, 0.0 }
  0xc6   : > { %v460_v63 = vpop.f32.mrf.mxu0 }
  0xc7   : > { %v461_v0 = vadd.f32 %v1303_v31, %v460_v63 }
  0xc9   : > { %v610_v2 = vmax.f32 %v461_v0, 0.0 }
  0xcb   : > { %v670_v5 = vpack.c.bf16 %v610_v2, %v609_v1 }
  0xcd   : > { %1162 = vmatmul.msk.bf16.gmra.mxu1 %vm719_vm1, %v670_v5  ;;  %v270_v5 = vld [vmem:[%s1266_s26 + $0x148] sm:$0xff] }
  0xce   : > { %v463_v7 = vpop.f32.mrf.mxu0 }
  0xcf   : > { %v464_v8 = vadd.f32 %v1303_v31, %v463_v7 }
  0xd1   : > { %1131 = vmatmul.msk.bf16.gmra.mxu0 %vm337_vm0, %v305_v6  ;;  %v611_v11 = vmax.f32 %v464_v8, 0.0  ;;  %v313_v6 = vpack.c.bf16 %v270_v5, %v269_v4 }
  0xd3   : > { %1139 = vmatmul.msk.bf16.gmra.mxu3 %vm337_vm0, %v313_v6 }
  0xd6   : > { %v465_v9 = vpop.f32.mrf.mxu0 }
  0xd7   : > { %v466_v10 = vadd.f32 %v1303_v31, %v465_v9 }
  0xd9   : > { %v612_v12 = vmax.f32 %v466_v10, 0.0 }
  0xdb   : > { %v671_v15 = vpack.c.bf16 %v612_v12, %v611_v11 }
  0xdd   : > { %1163 = vmatmul.msk.bf16.gmra.mxu1 %vm719_vm1, %v671_v15 }
  0xde   : > { %v468_v17 = vpop.f32.mrf.mxu0 }
  0xdf   : > { %v469_v18 = vadd.f32 %v1303_v31, %v468_v17 }
  0xe1   : > { %1132 = vmatmul.msk.bf16.gmra.mxu0 %vm337_vm0, %v306_v16  ;;  %v613_v21 = vmax.f32 %v469_v18, 0.0  ;;  %v271_v18 = vld [vmem:[%s1266_s26 + $0x150] sm:$0xff] }
  0xe6   : > { %v470_v19 = vpop.f32.mrf.mxu0 }
  0xe7   : > { %v471_v20 = vadd.f32 %v1303_v31, %v470_v19  ;;  %v272_v19 = vld [vmem:[%s1266_s26 + $0x158] sm:$0xff] }
  0xe9   : > { %v614_v22 = vmax.f32 %v471_v20, 0.0  ;;  %v314_v20 = vpack.c.bf16 %v272_v19, %v271_v18 }
  0xeb   : > { %v672_v25 = vpack.c.bf16 %v614_v22, %v613_v21  ;;  %1140 = vmatmul.msk.bf16.gmra.mxu3 %vm337_vm0, %v314_v20 }
  0xed   : > { %1164 = vmatmul.msk.bf16.gmra.mxu1 %vm719_vm1, %v672_v25 }
  0xee   : > { %v473_v27 = vpop.f32.mrf.mxu0 }
  0xef   : > { %v474_v32 = vadd.f32 %v1303_v31, %v473_v27 }
  0xf1   : > { %1133 = vmatmul.msk.bf16.gmra.mxu0 %vm337_vm0, %v307_v26  ;;  %v615_v35 = vmax.f32 %v474_v32, 0.0 }
  0xf6   : > { %v475_v33 = vpop.f32.mrf.mxu0 }
  0xf7   : > { %v476_v34 = vadd.f32 %v1303_v31, %v475_v33  ;;  %v273_v33 = vld [vmem:[%s1266_s26 + $0x160] sm:$0xff] }
  0xf9   : > { %v616_v36 = vmax.f32 %v476_v34, 0.0  ;;  %v274_v34 = vld [vmem:[%s1266_s26 + $0x168] sm:$0xff] }
  0xfb   : > { %v673_v39 = vpack.c.bf16 %v616_v36, %v615_v35  ;;  %v315_v35 = vpack.c.bf16 %v274_v34, %v273_v33 }
  0xfd   : > { %1165 = vmatmul.msk.bf16.gmra.mxu1 %vm719_vm1, %v673_v39  ;;  %1141 = vmatmul.msk.bf16.gmra.mxu3 %vm337_vm0, %v315_v35 }
  0xfe   : > { %v478_v41 = vpop.f32.mrf.mxu0 }
  0xff   : > { %v479_v45 = vadd.f32 %v1303_v31, %v478_v41 }
 0x101   : > { %1134 = vmatmul.msk.bf16.gmra.mxu0 %vm337_vm0, %v308_v40  ;;  %v617_v48 = vmax.f32 %v479_v45, 0.0 }
 0x106   : > { %v480_v46 = vpop.f32.mrf.mxu0 }
 0x107   : > { %v481_v47 = vadd.f32 %v1303_v31, %v480_v46 }
 0x109   : > { %v618_v49 = vmax.f32 %v481_v47, 0.0  ;;  %v275_v47 = vld [vmem:[%s1266_s26 + $0x170] sm:$0xff] }
 0x10b   : > { %v674_v52 = vpack.c.bf16 %v618_v49, %v617_v48  ;;  %v276_v48 = vld [vmem:[%s1266_s26 + $0x178] sm:$0xff] }
 0x10c   : > { %v316_v49 = vpack.c.bf16 %v276_v48, %v275_v47 }
 0x10d   : > { %1166 = vmatmul.msk.bf16.gmra.mxu1 %vm719_vm1, %v674_v52 }
 0x10e   : > { %v483_v54 = vpop.f32.mrf.mxu0  ;;  %1142 = vmatmul.msk.bf16.gmra.mxu3 %vm337_vm0, %v316_v49 }
 0x10f   : > { %v484_v58 = vadd.f32 %v1303_v31, %v483_v54 }
 0x111   : > { %1135 = vmatmul.msk.bf16.gmra.mxu0 %vm337_vm0, %v309_v53  ;;  %v619_v62 = vmax.f32 %v484_v58, 0.0 }
 0x116   : > { %v485_v59 = vpop.f32.mrf.mxu0 }
 0x117   : > { %v486_v60 = vadd.f32 %v1303_v31, %v485_v59  ;;  %v528_v19 = vpop.f32.mrf.mxu3 }
 0x119   : > { %v620_v63 = vmax.f32 %v486_v60, 0.0 }
 0x11a   : > { %v825_v0 = vpop.f32.mrf.mxu1 }
 0x11b   : > { %v675_v1 = vpack.c.bf16 %v620_v63, %v619_v62  ;;  %v826_v2 = vadd.f32 %v1368_v61, %v825_v0  ;;  %v277_v62 = vld [vmem:[%s1266_s26 + $0x180] sm:$0xff]  ;;  %v278_v63 = vld [vmem:[%s1266_s26 + $0x188] sm:$0xff] }
 0x11c   : > { %v317_v0 = vpack.c.bf16 %v278_v63, %v277_v62  ;;  %v286_v62 = vld [vmem:[%s1266_s26 + $0x1c8] sm:$0xff] }
 0x11d   : > { %986 = vst.msk [vmem:[%s1375_s12] sm:$0xff] %vm985_vm2, %v826_v2  ;;  %1167 = vmatmul.msk.bf16.gmra.mxu1 %vm719_vm1, %v675_v1 }
 0x11e   : > { %v488_v3 = vpop.f32.mrf.mxu0  ;;  %1143 = vmatmul.msk.bf16.gmra.mxu3 %vm337_vm0, %v317_v0 }
 0x11f   : > { %v489_v9 = vadd.f32 %v1303_v31, %v488_v3 }
 0x121   : > { %v621_v12 = vmax.f32 %v489_v9, 0.0 }
 0x122   : > { %v827_v7 = vpop.f32.mrf.mxu1 }
 0x123   : > { %v828_v8 = vadd.f32 %v1368_v61, %v827_v7 }
 0x125   : > { %987 = vst.msk [vmem:[%s1375_s12 + $0x8] sm:$0xff] %vm985_vm2, %v828_v8 }
 0x126   : > { %v490_v10 = vpop.f32.mrf.mxu0 }
 0x127   : > { %v491_v11 = vadd.f32 %v1303_v31, %v490_v10 }
 0x129   : > { %v622_v13 = vmax.f32 %v491_v11, 0.0 }
 0x12a   : > { %v830_v14 = vpop.f32.mrf.mxu1 }
 0x12b   : > { %v676_v15 = vpack.c.bf16 %v622_v13, %v621_v12  ;;  %v831_v16 = vadd.f32 %v1368_v61, %v830_v14  ;;  %v279_v12 = vld [vmem:[%s1266_s26 + $0x190] sm:$0xff]  ;;  %v280_v13 = vld [vmem:[%s1266_s26 + $0x198] sm:$0xff] }
 0x12c   : > { %v318_v14 = vpack.c.bf16 %v280_v13, %v279_v12  ;;  %v288_v12 = vld [vmem:[%s1266_s26 + $0x1d8] sm:$0xff] }
 0x12d   : > { %988 = vst.msk [vmem:[%s1375_s12 + $0x10] sm:$0xff] %vm985_vm2, %v831_v16  ;;  %1168 = vmatmul.msk.bf16.gmra.mxu1 %vm719_vm1, %v676_v15 }
 0x12e   : > { %v493_v17 = vpop.f32.mrf.mxu0  ;;  %1144 = vmatmul.msk.bf16.gmra.mxu3 %vm337_vm0, %v318_v14 }
 0x12f   : > { %v494_v23 = vadd.f32 %v1303_v31, %v493_v17 }
 0x131   : > { %v623_v26 = vmax.f32 %v494_v23, 0.0 }
 0x132   : > { %v832_v21 = vpop.f32.mrf.mxu1 }
 0x133   : > { %v833_v22 = vadd.f32 %v1368_v61, %v832_v21 }
 0x135   : > { %989 = vst.msk [vmem:[%s1375_s12 + $0x18] sm:$0xff] %vm985_vm2, %v833_v22 }
 0x136   : > { %v495_v24 = vpop.f32.mrf.mxu0 }
 0x137   : > { %v496_v25 = vadd.f32 %v1303_v31, %v495_v24 }
 0x139   : > { %v624_v27 = vmax.f32 %v496_v25, 0.0 }
 0x13a   : > { %v835_v28 = vpop.f32.mrf.mxu1 }
 0x13b   : > { %v677_v29 = vpack.c.bf16 %v624_v27, %v623_v26  ;;  %v836_v30 = vadd.f32 %v1368_v61, %v835_v28  ;;  %v530_v27 = vpop.f32.mrf.mxu3  ;;  %v281_v28 = vld [vmem:[%s1266_s26 + $0x1a0] sm:$0xff] }
 0x13d   : > { %990 = vst.msk [vmem:[%s1375_s12 + $0x20] sm:$0xff] %vm985_vm2, %v836_v30  ;;  %1169 = vmatmul.msk.bf16.gmra.mxu1 %vm719_vm1, %v677_v29  ;;  %v282_v29 = vld [vmem:[%s1266_s26 + $0x1a8] sm:$0xff] }
 0x13e   : > { %v498_v32 = vpop.f32.mrf.mxu0  ;;  %v319_v30 = vpack.c.bf16 %v282_v29, %v281_v28 }
 0x13f   : > { %v499_v38 = vadd.f32 %v1303_v31, %v498_v32 }
 0x140   : > { %1145 = vmatmul.msk.bf16.gmra.mxu3 %vm337_vm0, %v319_v30 }
 0x141   : > { %v625_v41 = vmax.f32 %v499_v38, 0.0 }
 0x142   : > { %v837_v36 = vpop.f32.mrf.mxu1 }
 0x143   : > { %v838_v37 = vadd.f32 %v1368_v61, %v837_v36  ;;  %v533_v36 = vpop.f32.mrf.mxu3 }
 0x145   : > { %991 = vst.msk [vmem:[%s1375_s12 + $0x28] sm:$0xff] %vm985_vm2, %v838_v37 }
 0x146   : > { %v500_v39 = vpop.f32.mrf.mxu0 }
 0x147   : > { %v501_v40 = vadd.f32 %v1303_v31, %v500_v39 }
 0x149   : > { %v626_v42 = vmax.f32 %v501_v40, 0.0 }
 0x14a   : > { %v840_v43 = vpop.f32.mrf.mxu1 }
 0x14b   : > { %v678_v44 = vpack.c.bf16 %v626_v42, %v625_v41  ;;  %v841_v45 = vadd.f32 %v1368_v61, %v840_v43 }
 0x14d   : > { %992 = vst.msk [vmem:[%s1375_s12 + $0x30] sm:$0xff] %vm985_vm2, %v841_v45  ;;  %1170 = vmatmul.msk.bf16.gmra.mxu1 %vm719_vm1, %v678_v44  ;;  %v535_v44 = vpop.f32.mrf.mxu3  ;;  %v283_v45 = vld [vmem:[%s1266_s26 + $0x1b0] sm:$0xff] }
 0x14e   : > { %v503_v46 = vpop.f32.mrf.mxu0 }
 0x14f   : > { %v504_v52 = vadd.f32 %v1303_v31, %v503_v46  ;;  %v284_v46 = vld [vmem:[%s1266_s26 + $0x1b8] sm:$0xff] }
 0x150   : > { %v320_v47 = vpack.c.bf16 %v284_v46, %v283_v45 }
 0x151   : > { %v627_v55 = vmax.f32 %v504_v52, 0.0 }
 0x152   : > { %v842_v50 = vpop.f32.mrf.mxu1  ;;  %1146 = vmatmul.msk.bf16.gmra.mxu3 %vm337_vm0, %v320_v47 }
 0x153   : > { %v843_v51 = vadd.f32 %v1368_v61, %v842_v50 }
 0x155   : > { %993 = vst.msk [vmem:[%s1375_s12 + $0x38] sm:$0xff] %vm985_vm2, %v843_v51  ;;  %v538_v52 = vpop.f32.mrf.mxu3 }
 0x156   : > { %v505_v53 = vpop.f32.mrf.mxu0  ;;  %v539_v29 = vadd.f32 %v1303_v31, %v538_v52 }
 0x157   : > { %v506_v54 = vadd.f32 %v1303_v31, %v505_v53 }
 0x159   : > { %v628_v56 = vmax.f32 %v506_v54, 0.0 }
 0x15a   : > { %v845_v57 = vpop.f32.mrf.mxu1 }
 0x15b   : > { %v679_v58 = vpack.c.bf16 %v628_v56, %v627_v55  ;;  %v846_v59 = vadd.f32 %v1368_v61, %v845_v57 }
 0x15d   : > { %994 = vst.msk [vmem:[%s1375_s12 + $0x40] sm:$0xff] %vm985_vm2, %v846_v59  ;;  %1171 = vmatmul.msk.bf16.gmra.mxu1 %vm719_vm1, %v679_v58  ;;  %v540_v59 = vpop.f32.mrf.mxu3 }
 0x15e   : > { %v508_v60 = vpop.f32.mrf.mxu0  ;;  %v541_v30 = vadd.f32 %v1303_v31, %v540_v59 }
 0x15f   : > { %v509_v3 = vadd.f32 %v1303_v31, %v508_v60  ;;  %v285_v60 = vld [vmem:[%s1266_s26 + $0x1c0] sm:$0xff] }
 0x160   : > { %v321_v63 = vpack.c.bf16 %v286_v62, %v285_v60 }
 0x161   : > { %v629_v6 = vmax.f32 %v509_v3, 0.0 }
 0x162   : > { %v847_v1 = vpop.f32.mrf.mxu1  ;;  %1147 = vmatmul.msk.bf16.gmra.mxu3 %vm337_vm0, %v321_v63 }
 0x163   : > { %v848_v2 = vadd.f32 %v1368_v61, %v847_v1  ;;  %v529_v1 = vadd.f32 %v1303_v31, %v528_v19 }
 0x165   : > { %995 = vst.msk [vmem:[%s1375_s12 + $0x48] sm:$0xff] %vm985_vm2, %v848_v2  ;;  %v531_v2 = vadd.f32 %v1303_v31, %v530_v27 }
 0x166   : > { %v510_v4 = vpop.f32.mrf.mxu0 }
 0x167   : > { %v511_v5 = vadd.f32 %v1303_v31, %v510_v4  ;;  %v543_v4 = vpop.f32.mrf.mxu3 }
 0x169   : > { %v630_v7 = vmax.f32 %v511_v5, 0.0  ;;  %v637_v5 = vmax.f32 %v529_v1, 0.0 }
 0x16a   : > { %v850_v8 = vpop.f32.mrf.mxu1 }
 0x16b   : > { %v680_v9 = vpack.c.bf16 %v630_v7, %v629_v6  ;;  %v851_v10 = vadd.f32 %v1368_v61, %v850_v8  ;;  %v638_v6 = vmax.f32 %v531_v2, 0.0 }
 0x16d   : > { %996 = vst.msk [vmem:[%s1375_s12 + $0x50] sm:$0xff] %vm985_vm2, %v851_v10  ;;  %1172 = vmatmul.msk.bf16.gmra.mxu1 %vm719_vm1, %v680_v9  ;;  %v684_v9 = vpack.c.bf16 %v638_v6, %v637_v5 }
 0x16e   : > { %v513_v11 = vpop.f32.mrf.mxu0 }
 0x16f   : > { %v514_v17 = vadd.f32 %v1303_v31, %v513_v11  ;;  %v545_v10 = vpop.f32.mrf.mxu3  ;;  %v287_v11 = vld [vmem:[%s1266_s26 + $0x1d0] sm:$0xff] }
 0x170   : > { %v322_v13 = vpack.c.bf16 %v288_v12, %v287_v11  ;;  %v546_v45 = vadd.f32 %v1303_v31, %v545_v10 }
 0x171   : > { %v631_v21 = vmax.f32 %v514_v17, 0.0 }
 0x172   : > { %v852_v15 = vpop.f32.mrf.mxu1  ;;  %1148 = vmatmul.msk.bf16.gmra.mxu3 %vm337_vm0, %v322_v13 }
 0x173   : > { %v853_v16 = vadd.f32 %v1368_v61, %v852_v15  ;;  %v534_v15 = vadd.f32 %v1303_v31, %v533_v36 }
 0x175   : > { %997 = vst.msk [vmem:[%s1375_s12 + $0x58] sm:$0xff] %vm985_vm2, %v853_v16  ;;  %v536_v16 = vadd.f32 %v1303_v31, %v535_v44  ;;  %v639_v19 = vmax.f32 %v534_v15, 0.0  ;;  %v544_v44 = vadd.f32 %v1303_v31, %v543_v4 }
 0x176   : > { %v515_v18 = vpop.f32.mrf.mxu0 }
 0x177   : > { %v516_v20 = vadd.f32 %v1303_v31, %v515_v18  ;;  %v548_v18 = vpop.f32.mrf.mxu3 }
 0x179   : > { %v632_v22 = vmax.f32 %v516_v20, 0.0  ;;  %v640_v20 = vmax.f32 %v536_v16, 0.0 }
 0x17a   : > { %v855_v23 = vpop.f32.mrf.mxu1 }
 0x17b   : > { %v681_v24 = vpack.c.bf16 %v632_v22, %v631_v21  ;;  %v856_v25 = vadd.f32 %v1368_v61, %v855_v23  ;;  %v685_v23 = vpack.c.bf16 %v640_v20, %v639_v19 }
 0x17d   : > { %998 = vst.msk [vmem:[%s1375_s12 + $0x60] sm:$0xff] %vm985_vm2, %v856_v25  ;;  %1173 = vmatmul.msk.bf16.gmra.mxu1 %vm719_vm1, %v681_v24  ;;  %v289_v25 = vld [vmem:[%s1266_s26 + $0x1e0] sm:$0xff] }
 0x17e   : > { %v518_v26 = vpop.f32.mrf.mxu0 }
 0x17f   : > { %v519_v34 = vadd.f32 %v1303_v31, %v518_v26  ;;  %v550_v24 = vpop.f32.mrf.mxu3  ;;  %v290_v26 = vld [vmem:[%s1266_s26 + $0x1e8] sm:$0xff] }
 0x180   : > { %v323_v27 = vpack.c.bf16 %v290_v26, %v289_v25 }
 0x181   : > { %v633_v38 = vmax.f32 %v519_v34, 0.0  ;;  %v641_v34 = vmax.f32 %v539_v29, 0.0 }
 0x182   : > { %v857_v32 = vpop.f32.mrf.mxu1  ;;  %1149 = vmatmul.msk.bf16.gmra.mxu3 %vm337_vm0, %v323_v27 }
 0x183   : > { %v858_v33 = vadd.f32 %v1368_v61, %v857_v32 }
 0x185   : > { %999 = vst.msk [vmem:[%s1375_s12 + $0x68] sm:$0xff] %vm985_vm2, %v858_v33 }
 0x186   : > { %v520_v35 = vpop.f32.mrf.mxu0 }
 0x187   : > { %v521_v37 = vadd.f32 %v1303_v31, %v520_v35  ;;  %v553_v33 = vpop.f32.mrf.mxu3  ;;  %v642_v35 = vmax.f32 %v541_v30, 0.0 }
 0x188   : > { %v554_v2 = vadd.f32 %v1303_v31, %v553_v33 }
 0x189   : > { %v634_v39 = vmax.f32 %v521_v37, 0.0 }
 0x18a   : > { %v860_v40 = vpop.f32.mrf.mxu1  ;;  %v647_v6 = vmax.f32 %v554_v2, 0.0 }
 0x18b   : > { %v682_v41 = vpack.c.bf16 %v634_v39, %v633_v38  ;;  %v861_v42 = vadd.f32 %v1368_v61, %v860_v40  ;;  %v686_v38 = vpack.c.bf16 %v642_v35, %v641_v34  ;;  %v291_v40 = vld [vmem:[%s1266_s26 + $0x1f0] sm:$0xff] }
 0x18d   : > { %1000 = vst.msk [vmem:[%s1375_s12 + $0x70] sm:$0xff] %vm985_vm2, %v861_v42  ;;  %1174 = vmatmul.msk.bf16.gmra.mxu1 %vm719_vm1, %v682_v41  ;;  %v292_v41 = vld [vmem:[%s1266_s26 + $0x1f8] sm:$0xff] }
 0x18e   : > { %v523_v43 = vpop.f32.mrf.mxu0  ;;  %v324_v42 = vpack.c.bf16 %v292_v41, %v291_v40 }
 0x18f   : > { %v524_v50 = vadd.f32 %v1303_v31, %v523_v43  ;;  %v555_v39 = vpop.f32.mrf.mxu3 }
 0x191   : > { %v635_v54 = vmax.f32 %v524_v50, 0.0 }
 0x192   : > { %v862_v48 = vpop.f32.mrf.mxu1  ;;  %1150 = vmatmul.msk.bf16.gmra.mxu3 %vm337_vm0, %v324_v42 }
 0x193   : > { %v863_v49 = vadd.f32 %v1368_v61, %v862_v48  ;;  %v643_v48 = vmax.f32 %v544_v44, 0.0 }
 0x195   : > { %1001 = vst.msk [vmem:[%s1375_s12 + $0x78] sm:$0xff] %vm985_vm2, %v863_v49  ;;  %v644_v49 = vmax.f32 %v546_v45, 0.0 }
 0x196   : > { %v525_v51 = vpop.f32.mrf.mxu0 }
 0x197   : > { %v526_v53 = vadd.f32 %v1303_v31, %v525_v51  ;;  %v558_v47 = vpop.f32.mrf.mxu3  ;;  %v687_v51 = vpack.c.bf16 %v644_v49, %v643_v48 }
 0x198   : > { %v559_v13 = vadd.f32 %v1303_v31, %v558_v47 }
 0x199   : > { %v636_v55 = vmax.f32 %v526_v53, 0.0 }
 0x19a   : > { %v865_v56 = vpop.f32.mrf.mxu1  ;;  %v649_v16 = vmax.f32 %v559_v13, 0.0 }
 0x19b   : > { %v683_v57 = vpack.c.bf16 %v636_v55, %v635_v54  ;;  %v866_v58 = vadd.f32 %v1368_v61, %v865_v56  ;;  %v549_v55 = vadd.f32 %v1303_v31, %v548_v18  ;;  %v551_v56 = vadd.f32 %v1303_v31, %v550_v24 }
 0x19d   : > { %1002 = vst.msk [vmem:[%s1375_s12 + $0x80] sm:$0xff] %vm985_vm2, %v866_v58  ;;  %1175 = vmatmul.msk.bf16.vlgmr.msra.gmra.mxu2 %vm719_vm1, %v683_v57  ;;  %v645_v58 = vmax.f32 %v549_v55, 0.0  ;;  %v646_v59 = vmax.f32 %v551_v56, 0.0 }
 0x19f   : > { %v560_v53 = vpop.f32.mrf.mxu3  ;;  %v688_v63 = vpack.c.bf16 %v646_v59, %v645_v58 }
 0x1a2   : > { %v867_v0 = vpop.f32.mrf.mxu1 }
 0x1a3   : > { %v868_v3 = vadd.f32 %v1368_v61, %v867_v0 }
 0x1a5   : > { %1003 = vst.msk [vmem:[%s1375_s12 + $0x88] sm:$0xff] %vm985_vm2, %v868_v3  ;;  %v556_v3 = vadd.f32 %v1303_v31, %v555_v39 }
 0x1a7   : > { %v563_v62 = vpop.f32.mrf.mxu3 }
 0x1a8   : > { %v564_v24 = vadd.f32 %v1303_v31, %v563_v62 }
 0x1aa   : > { %v870_v7 = vpop.f32.mrf.mxu1  ;;  %v651_v27 = vmax.f32 %v564_v24, 0.0 }
 0x1ab   : > { %v871_v8 = vadd.f32 %v1368_v61, %v870_v7  ;;  %v648_v7 = vmax.f32 %v556_v3, 0.0 }
 0x1ad   : > { %1004 = vst.msk [vmem:[%s1375_s12 + $0x90] sm:$0xff] %vm985_vm2, %v871_v8  ;;  %1176 = vmatmul.msk.bf16.gmra.mxu2 %vm719_vm1, %v684_v9  ;;  %v689_v9 = vpack.c.bf16 %v648_v7, %v647_v6 }
 0x1af   : > { %v565_v5 = vpop.f32.mrf.mxu3 }
 0x1b0   : > { %v566_v25 = vadd.f32 %v1303_v31, %v565_v5 }
 0x1b2   : > { %v872_v14 = vpop.f32.mrf.mxu1 }
 0x1b3   : > { %v873_v17 = vadd.f32 %v1368_v61, %v872_v14  ;;  %v561_v14 = vadd.f32 %v1303_v31, %v560_v53 }
 0x1b5   : > { %1005 = vst.msk [vmem:[%s1375_s12 + $0x98] sm:$0xff] %vm985_vm2, %v873_v17  ;;  %v650_v17 = vmax.f32 %v561_v14, 0.0 }
 0x1b7   : > { %v568_v11 = vpop.f32.mrf.mxu3  ;;  %v690_v20 = vpack.c.bf16 %v650_v17, %v649_v16 }
 0x1b8   : > { %v569_v34 = vadd.f32 %v1303_v31, %v568_v11 }
 0x1ba   : > { %v875_v21 = vpop.f32.mrf.mxu1 }
 0x1bb   : > { %v876_v22 = vadd.f32 %v1368_v61, %v875_v21 }
 0x1bd   : > { %1006 = vst.msk [vmem:[%s1375_s12 + $0xa0] sm:$0xff] %vm985_vm2, %v876_v22  ;;  %1177 = vmatmul.msk.bf16.gmra.mxu2 %vm719_vm1, %v685_v23 }
 0x1bf   : > { %v570_v18 = vpop.f32.mrf.mxu3 }
 0x1c0   : > { %v571_v35 = vadd.f32 %v1303_v31, %v570_v18 }
 0x1c2   : > { %v877_v28 = vpop.f32.mrf.mxu1 }
 0x1c3   : > { %v878_v32 = vadd.f32 %v1368_v61, %v877_v28  ;;  %v652_v28 = vmax.f32 %v566_v25, 0.0 }
 0x1c5   : > { %1007 = vst.msk [vmem:[%s1375_s12 + $0xa8] sm:$0xff] %vm985_vm2, %v878_v32  ;;  %v691_v29 = vpack.c.bf16 %v652_v28, %v651_v27 }
 0x1c7   : > { %v573_v23 = vpop.f32.mrf.mxu3 }
 0x1c8   : > { %v574_v45 = vadd.f32 %v1303_v31, %v573_v23 }
 0x1ca   : > { %v880_v36 = vpop.f32.mrf.mxu1  ;;  %v655_v47 = vmax.f32 %v574_v45, 0.0 }
 0x1cb   : > { %v881_v37 = vadd.f32 %v1368_v61, %v880_v36 }
 0x1cd   : > { %1008 = vst.msk [vmem:[%s1375_s12 + $0xb0] sm:$0xff] %vm985_vm2, %v881_v37  ;;  %1178 = vmatmul.msk.bf16.gmra.mxu2 %vm719_vm1, %v686_v38  ;;  %v653_v37 = vmax.f32 %v569_v34, 0.0  ;;  %v654_v38 = vmax.f32 %v571_v35, 0.0 }
 0x1cf   : > { %v575_v30 = vpop.f32.mrf.mxu3  ;;  %v692_v41 = vpack.c.bf16 %v654_v38, %v653_v37 }
 0x1d2   : > { %v882_v43 = vpop.f32.mrf.mxu1 }
 0x1d3   : > { %v883_v46 = vadd.f32 %v1368_v61, %v882_v43 }
 0x1d5   : > { %1009 = vst.msk [vmem:[%s1375_s12 + $0xb8] sm:$0xff] %vm985_vm2, %v883_v46  ;;  %v576_v46 = vadd.f32 %v1303_v31, %v575_v30 }
 0x1d7   : > { %v578_v36 = vpop.f32.mrf.mxu3  ;;  %v656_v48 = vmax.f32 %v576_v46, 0.0 }
 0x1d8   : > { %v579_v55 = vadd.f32 %v1303_v31, %v578_v36 }
 0x1da   : > { %v885_v50 = vpop.f32.mrf.mxu1  ;;  %v657_v58 = vmax.f32 %v579_v55, 0.0 }
 0x1db   : > { %v886_v52 = vadd.f32 %v1368_v61, %v885_v50 }
 0x1dd   : > { %1010 = vst.msk [vmem:[%s1375_s12 + $0xc0] sm:$0xff] %vm985_vm2, %v886_v52  ;;  %1179 = vmatmul.msk.bf16.gmra.mxu2 %vm719_vm1, %v687_v51  ;;  %v693_v52 = vpack.c.bf16 %v656_v48, %v655_v47 }
 0x1df   : > { %v580_v43 = vpop.f32.mrf.mxu3 }
 0x1e0   : > { %v581_v56 = vadd.f32 %v1303_v31, %v580_v43 }
 0x1e2   : > { %v887_v54 = vpop.f32.mrf.mxu1  ;;  %v658_v59 = vmax.f32 %v581_v56, 0.0 }
 0x1e3   : > { %v888_v57 = vadd.f32 %v1368_v61, %v887_v54 }
 0x1e5   : > { %1011 = vst.msk [vmem:[%s1375_s12 + $0xc8] sm:$0xff] %vm985_vm2, %v888_v57 }
 0x1e7   : > { %v583_v51 = vpop.f32.mrf.mxu3 }
 0x1e8   : > { %v584_v3 = vadd.f32 %v1303_v31, %v583_v51 }
 0x1ea   : > { %v890_v60 = vpop.f32.mrf.mxu1  ;;  %v659_v5 = vmax.f32 %v584_v3, 0.0 }
 0x1eb   : > { %v891_v0 = vadd.f32 %v1368_v61, %v890_v60 }
 0x1ed   : > { %1012 = vst.msk [vmem:[%s1375_s12 + $0xd0] sm:$0xff] %vm985_vm2, %v891_v0  ;;  %1180 = vmatmul.msk.bf16.gmra.mxu2 %vm719_vm1, %v688_v63  ;;  %v694_v63 = vpack.c.bf16 %v658_v59, %v657_v58 }
 0x1ef   : > { %v585_v57 = vpop.f32.mrf.mxu3 }
 0x1f2   : > { %v892_v1 = vpop.f32.mrf.mxu1 }
 0x1f3   : > { %v893_v4 = vadd.f32 %v1368_v61, %v892_v1 }
 0x1f5   : > { %1013 = vst.msk [vmem:[%s1375_s12 + $0xd8] sm:$0xff] %vm985_vm2, %v893_v4  ;;  %v586_v4 = vadd.f32 %v1303_v31, %v585_v57 }
 0x1f7   : > { %v588_v0 = vpop.f32.mrf.mxu3  ;;  %v660_v6 = vmax.f32 %v586_v4, 0.0 }
 0x1f8   : > { %v589_v14 = vadd.f32 %v1303_v31, %v588_v0 }
 0x1fa   : > { %v895_v8 = vpop.f32.mrf.mxu1  ;;  %v661_v16 = vmax.f32 %v589_v14, 0.0 }
 0x1fb   : > { %v896_v10 = vadd.f32 %v1368_v61, %v895_v8 }
 0x1fd   : > { %1014 = vst.msk [vmem:[%s1375_s12 + $0xe0] sm:$0xff] %vm985_vm2, %v896_v10  ;;  %1181 = vmatmul.msk.bf16.gmra.mxu2 %vm719_vm1, %v689_v9  ;;  %v695_v10 = vpack.c.bf16 %v660_v6, %v659_v5 }
 0x1ff   : > { %v590_v8 = vpop.f32.mrf.mxu3 }
 0x202   : > { %v897_v12 = vpop.f32.mrf.mxu1 }
 0x203   : > { %v898_v15 = vadd.f32 %v1368_v61, %v897_v12 }
 0x205   : > { %1015 = vst.msk [vmem:[%s1375_s12 + $0xe8] sm:$0xff] %vm985_vm2, %v898_v15  ;;  %v591_v15 = vadd.f32 %v1303_v31, %v590_v8 }
 0x207   : > { %v593_v13 = vpop.f32.mrf.mxu3  ;;  %v662_v17 = vmax.f32 %v591_v15, 0.0 }
 0x208   : > { %v594_v24 = vadd.f32 %v1303_v31, %v593_v13 }
 0x20a   : > { %v900_v19 = vpop.f32.mrf.mxu1  ;;  %v663_v27 = vmax.f32 %v594_v24, 0.0 }
 0x20b   : > { %v901_v21 = vadd.f32 %v1368_v61, %v900_v19 }
 0x20d   : > { %1016 = vst.msk [vmem:[%s1375_s12 + $0xf0] sm:$0xff] %vm985_vm2, %v901_v21  ;;  %1182 = vmatmul.msk.bf16.gmra.mxu2 %vm719_vm1, %v690_v20  ;;  %v696_v20 = vpack.c.bf16 %v662_v17, %v661_v16 }
 0x20f   : > { %v595_v21 = vpop.f32.mrf.mxu3 }
 0x210   : > { %v596_v25 = vadd.f32 %v1303_v31, %v595_v21 }
 0x212   : > { %v902_v22 = vpop.f32.mrf.mxu1  ;;  %v664_v28 = vmax.f32 %v596_v25, 0.0 }
 0x213   : > { %v903_v26 = vadd.f32 %v1368_v61, %v902_v22 }
 0x215   : > { %1017 = vst.msk [vmem:[%s1375_s12 + $0xf8] sm:$0xff] %vm985_vm2, %v903_v26 }
 0x217   : > { %v598_v26 = vpop.f32.mrf.mxu3 }
 0x218   : > { %v599_v36 = vadd.f32 %v1303_v31, %v598_v26 }
 0x21a   : > { %v665_v38 = vmax.f32 %v599_v36, 0.0 }
 0x21d   : > { %1183 = vmatmul.msk.bf16.gmra.mxu2 %vm719_vm1, %v691_v29 }
 0x220   : > { %v905_v32 = vpop.f32.mrf.mxu2 }
 0x221   : > { %v906_v33 = vadd.f32 %v1368_v61, %v905_v32  ;;  %v697_v32 = vpack.c.bf16 %v664_v28, %v663_v27 }
 0x223   : > { %1018 = vst.msk [vmem:[%s1375_s12 + $0x100] sm:$0xff] %vm985_vm2, %v906_v33  ;;  %v600_v33 = vpop.f32.mrf.mxu3 }
 0x224   : > { %v601_v37 = vadd.f32 %v1303_v31, %v600_v33 }
 0x228   : > { %v907_v39 = vpop.f32.mrf.mxu2 }
 0x229   : > { %v908_v40 = vadd.f32 %v1368_v61, %v907_v39  ;;  %v666_v39 = vmax.f32 %v601_v37, 0.0 }
 0x22b   : > { %1019 = vst.msk [vmem:[%s1375_s12 + $0x108] sm:$0xff] %vm985_vm2, %v908_v40 }
 0x22d   : > { %1184 = vmatmul.msk.bf16.gmra.mxu2 %vm719_vm1, %v692_v41 }
 0x230   : > { %v910_v42 = vpop.f32.mrf.mxu2 }
 0x231   : > { %v911_v44 = vadd.f32 %v1368_v61, %v910_v42  ;;  %v698_v42 = vpack.c.bf16 %v666_v39, %v665_v38 }
 0x233   : > { %1020 = vst.msk [vmem:[%s1375_s12 + $0x110] sm:$0xff] %vm985_vm2, %v911_v44 }
 0x238   : > { %v912_v49 = vpop.f32.mrf.mxu2 }
 0x239   : > { %v913_v50 = vadd.f32 %v1368_v61, %v912_v49 }
 0x23b   : > { %1021 = vst.msk [vmem:[%s1375_s12 + $0x118] sm:$0xff] %vm985_vm2, %v913_v50 }
 0x23d   : > { %1185 = vmatmul.msk.bf16.gmra.mxu2 %vm719_vm1, %v693_v52 }
 0x240   : > { %v915_v53 = vpop.f32.mrf.mxu2 }
 0x241   : > { %v916_v54 = vadd.f32 %v1368_v61, %v915_v53 }
 0x243   : > { %1022 = vst.msk [vmem:[%s1375_s12 + $0x120] sm:$0xff] %vm985_vm2, %v916_v54 }
 0x248   : > { %v917_v60 = vpop.f32.mrf.mxu2 }
 0x249   : > { %v918_v62 = vadd.f32 %v1368_v61, %v917_v60 }
 0x24b   : > { %1023 = vst.msk [vmem:[%s1375_s12 + $0x128] sm:$0xff] %vm985_vm2, %v918_v62 }
 0x24d   : > { %1186 = vmatmul.msk.bf16.gmra.mxu2 %vm719_vm1, %v694_v63 }
 0x250   : > { %v920_v1 = vpop.f32.mrf.mxu2 }
 0x251   : > { %v921_v2 = vadd.f32 %v1368_v61, %v920_v1 }
 0x253   : > { %1024 = vst.msk [vmem:[%s1375_s12 + $0x130] sm:$0xff] %vm985_vm2, %v921_v2 }
 0x258   : > { %v922_v7 = vpop.f32.mrf.mxu2 }
 0x259   : > { %v923_v9 = vadd.f32 %v1368_v61, %v922_v7 }
 0x25b   : > { %1025 = vst.msk [vmem:[%s1375_s12 + $0x138] sm:$0xff] %vm985_vm2, %v923_v9 }
 0x25d   : > { %1187 = vmatmul.msk.bf16.gmra.mxu2 %vm719_vm1, %v695_v10 }
 0x260   : > { %v925_v11 = vpop.f32.mrf.mxu2 }
 0x261   : > { %v926_v12 = vadd.f32 %v1368_v61, %v925_v11 }
 0x263   : > { %1026 = vst.msk [vmem:[%s1375_s12 + $0x140] sm:$0xff] %vm985_vm2, %v926_v12 }
 0x268   : > { %v927_v18 = vpop.f32.mrf.mxu2 }
 0x269   : > { %v928_v19 = vadd.f32 %v1368_v61, %v927_v18 }
 0x26b   : > { %1027 = vst.msk [vmem:[%s1375_s12 + $0x148] sm:$0xff] %vm985_vm2, %v928_v19 }
 0x26d   : > { %1188 = vmatmul.msk.bf16.gmra.mxu2 %vm719_vm1, %v696_v20 }
 0x270   : > { %v930_v22 = vpop.f32.mrf.mxu2 }
 0x271   : > { %v931_v23 = vadd.f32 %v1368_v61, %v930_v22 }
 0x273   : > { %1028 = vst.msk [vmem:[%s1375_s12 + $0x150] sm:$0xff] %vm985_vm2, %v931_v23 }
 0x278   : > { %v932_v29 = vpop.f32.mrf.mxu2 }
 0x279   : > { %v933_v30 = vadd.f32 %v1368_v61, %v932_v29 }
 0x27b   : > { %1029 = vst.msk [vmem:[%s1375_s12 + $0x158] sm:$0xff] %vm985_vm2, %v933_v30 }
 0x27d   : > { %1189 = vmatmul.msk.bf16.gmra.mxu2 %vm719_vm1, %v697_v32 }
 0x280   : > { %v935_v34 = vpop.f32.mrf.mxu2 }
 0x281   : > { %v936_v35 = vadd.f32 %v1368_v61, %v935_v34 }
 0x283   : > { %1030 = vst.msk [vmem:[%s1375_s12 + $0x160] sm:$0xff] %vm985_vm2, %v936_v35 }
 0x288   : > { %v937_v40 = vpop.f32.mrf.mxu2 }
 0x289   : > { %v938_v41 = vadd.f32 %v1368_v61, %v937_v40 }
 0x28b   : > { %1031 = vst.msk [vmem:[%s1375_s12 + $0x168] sm:$0xff] %vm985_vm2, %v938_v41 }
 0x28d   : > { %1190 = vmatmul.msk.bf16.gmra.mxu2 %vm719_vm1, %v698_v42 }
 0x290   : > { %v940_v43 = vpop.f32.mrf.mxu2 }
 0x291   : > { %v941_v44 = vadd.f32 %v1368_v61, %v940_v43 }
 0x293   : > { %1032 = vst.msk [vmem:[%s1375_s12 + $0x170] sm:$0xff] %vm985_vm2, %v941_v44 }
 0x298   : > { %v942_v31 = vpop.f32.mrf.mxu2 }
 0x299   : > { %v943_v45 = vadd.f32 %v1368_v61, %v942_v31 }
 0x29b   : > { %1033 = vst.msk [vmem:[%s1375_s12 + $0x178] sm:$0xff] %vm985_vm2, %v943_v45 }
 0x2a0   : > { %v945_v46 = vpop.f32.mrf.mxu2 }
 0x2a1   : > { %v946_v47 = vadd.f32 %v1368_v61, %v945_v46 }
 0x2a3   : > { %1034 = vst.msk [vmem:[%s1375_s12 + $0x180] sm:$0xff] %vm985_vm2, %v946_v47 }
 0x2a8   : > { %v947_v48 = vpop.f32.mrf.mxu2 }
 0x2a9   : > { %v948_v49 = vadd.f32 %v1368_v61, %v947_v48 }
 0x2ab   : > { %1035 = vst.msk [vmem:[%s1375_s12 + $0x188] sm:$0xff] %vm985_vm2, %v948_v49 }
 0x2b0   : > { %v950_v50 = vpop.f32.mrf.mxu2 }
 0x2b1   : > { %v951_v51 = vadd.f32 %v1368_v61, %v950_v50 }
 0x2b3   : > { %1036 = vst.msk [vmem:[%s1375_s12 + $0x190] sm:$0xff] %vm985_vm2, %v951_v51 }
 0x2b8   : > { %v952_v52 = vpop.f32.mrf.mxu2 }
 0x2b9   : > { %v953_v53 = vadd.f32 %v1368_v61, %v952_v52 }
 0x2bb   : > { %1037 = vst.msk [vmem:[%s1375_s12 + $0x198] sm:$0xff] %vm985_vm2, %v953_v53 }
 0x2c0   : > { %v955_v54 = vpop.f32.mrf.mxu2 }
 0x2c1   : > { %v956_v55 = vadd.f32 %v1368_v61, %v955_v54 }
 0x2c3   : > { %1038 = vst.msk [vmem:[%s1375_s12 + $0x1a0] sm:$0xff] %vm985_vm2, %v956_v55 }
 0x2c8   : > { %v957_v56 = vpop.f32.mrf.mxu2 }
 0x2c9   : > { %v958_v57 = vadd.f32 %v1368_v61, %v957_v56 }
 0x2cb   : > { %1039 = vst.msk [vmem:[%s1375_s12 + $0x1a8] sm:$0xff] %vm985_vm2, %v958_v57 }
 0x2d0   : > { %v960_v58 = vpop.f32.mrf.mxu2 }
 0x2d1   : > { %v961_v59 = vadd.f32 %v1368_v61, %v960_v58 }
 0x2d3   : > { %1040 = vst.msk [vmem:[%s1375_s12 + $0x1b0] sm:$0xff] %vm985_vm2, %v961_v59 }
 0x2d8   : > { %v962_v60 = vpop.f32.mrf.mxu2 }
 0x2d9   : > { %v963_v62 = vadd.f32 %v1368_v61, %v962_v60 }
 0x2db   : > { %1041 = vst.msk [vmem:[%s1375_s12 + $0x1b8] sm:$0xff] %vm985_vm2, %v963_v62 }
 0x2e0   : > { %v965_v63 = vpop.f32.mrf.mxu2 }
 0x2e1   : > { %v966_v0 = vadd.f32 %v1368_v61, %v965_v63 }
 0x2e3   : > { %1042 = vst.msk [vmem:[%s1375_s12 + $0x1c0] sm:$0xff] %vm985_vm2, %v966_v0 }
 0x2e8   : > { %v967_v1 = vpop.f32.mrf.mxu2 }
 0x2e9   : > { %v968_v2 = vadd.f32 %v1368_v61, %v967_v1 }
 0x2eb   : > { %1043 = vst.msk [vmem:[%s1375_s12 + $0x1c8] sm:$0xff] %vm985_vm2, %v968_v2 }
 0x2f0   : > { %v970_v3 = vpop.f32.mrf.mxu2 }
 0x2f1   : > { %v971_v4 = vadd.f32 %v1368_v61, %v970_v3 }
 0x2f3   : > { %1044 = vst.msk [vmem:[%s1375_s12 + $0x1d0] sm:$0xff] %vm985_vm2, %v971_v4 }
 0x2f8   : > { %v972_v5 = vpop.f32.mrf.mxu2 }
 0x2f9   : > { %v973_v6 = vadd.f32 %v1368_v61, %v972_v5 }
 0x2fb   : > { %1045 = vst.msk [vmem:[%s1375_s12 + $0x1d8] sm:$0xff] %vm985_vm2, %v973_v6 }
 0x300   : > { %v975_v7 = vpop.f32.mrf.mxu2 }
 0x301   : > { %v976_v8 = vadd.f32 %v1368_v61, %v975_v7 }
 0x303   : > { %1046 = vst.msk [vmem:[%s1375_s12 + $0x1e0] sm:$0xff] %vm985_vm2, %v976_v8 }
 0x308   : > { %v977_v9 = vpop.f32.mrf.mxu2 }
 0x309   : > { %v978_v10 = vadd.f32 %v1368_v61, %v977_v9 }
 0x30b   : > { %1047 = vst.msk [vmem:[%s1375_s12 + $0x1e8] sm:$0xff] %vm985_vm2, %v978_v10 }
 0x310   : > { %v980_v11 = vpop.f32.mrf.mxu2 }
 0x311   : > { %v981_v12 = vadd.f32 %v1368_v61, %v980_v11 }
 0x313   : > { %1048 = vst.msk [vmem:[%s1375_s12 + $0x1f0] sm:$0xff] %vm985_vm2, %v981_v12 }
 0x318   : > { %v982_v13 = vpop.f32.mrf.mxu2 }
 0x319   : > { %v983_v14 = vadd.f32 %v1368_v61, %v982_v13 }
 0x31b   : > { %1049 = vst.msk [vmem:[%s1375_s12 + $0x1f8] sm:$0xff] %vm985_vm2, %v983_v14 }
 0x31c PF: > { %s15_s18 = sadd.s32 1, %s1215_s18  }
 0x31d   : > { %p12_p4 = scmp.ge.s32.totalorder %s15_s18, 4  }
 0x31f   :  { %14 = sbr.rel (!%p12_p4) target bundleno = 1 (0x1), region = 70 }

</bundles_post_ra>
